<compile_context>
chip_gen: v7x
topology: tpu7x:2x2x1
jax: 0.10.0
libtpu: 0.0.40
codegen_flags: <defaults>
</compile_context>

<pallas_src>
import functools

import jax
import jax.numpy as jnp
from jax.experimental import pallas as pl
from jax.experimental.pallas import tpu as pltpu


def get_bond_feature_dims():
    # OGB's standard bond feature dims (bond_type, bond_stereo, is_conjugated).
    return [5, 6, 2]


FULL_BOND_FEATURE_DIMS = get_bond_feature_dims()


def _round_up(x, m):
    return ((x + m - 1) // m) * m


def _bond_encoder_kernel(attr_ref, table_ref, out_ref, *, num_features):
    """attr_ref: [TE, F] int32 (already offset-adjusted into the fused table's
    row space); table_ref: [K, Dp] f32 fused table; out_ref: [TE, Dp] f32."""
    attr = attr_ref[...]                                   # [TE, F] int32
    te = out_ref.shape[0]
    k = table_ref.shape[0]

    # One hoisted iota; F cheap compares summed into a single multi-hot block.
    iota = jax.lax.broadcasted_iota(jnp.int32, (te, k), 1)  # [TE, K]
    multi_hot = jnp.zeros((te, k), jnp.float32)
    for f in range(num_features):
        multi_hot += (iota == attr[:, f:f + 1]).astype(jnp.float32)

    # Single MXU matmul against the fully-resident fused table.
    out_ref[...] = jnp.dot(
        multi_hot, table_ref[...], preferred_element_type=jnp.float32
    ).astype(out_ref.dtype)


def bond_encoder_pallas(edge_attr, tables, *, tile_e=1024):
    """edge_attr: [E, F] int32; tables: list of [dim_i, D] f32 arrays.

    Returns [E, D] f32 (sum of per-feature embedding lookups)."""
    E, F = edge_attr.shape
    assert F == len(tables)
    D = tables[0].shape[1]

    dims = [int(t.shape[0]) for t in tables]
    offsets = []
    off = 0
    for d in dims:
        offsets.append(off)
        off += d
    total_rows = off

    K = _round_up(total_rows, 8)        # sublane-aligned contraction dim
    Dp = _round_up(D, 128)              # lane-dense output / table last dim

    # Fused, zero-padded table [K, Dp].
    fused = jnp.zeros((K, Dp), jnp.float32)
    for t, o in zip(tables, offsets):
        fused = fused.at[o:o + t.shape[0], :D].set(t.astype(jnp.float32))

    # Offset-adjusted edge attributes (each feature indexes its own row range).
    attr = edge_attr.astype(jnp.int32) + jnp.asarray(offsets, jnp.int32)[None, :]

    # Tile sizing: large tiles to amortize per-grid-step overhead, but don't
    # exceed (rounded-up) E for tiny inputs.  Pad E to a multiple of the tile.
    tile_e_eff = max(8, min(tile_e, _round_up(E, 8)))
    E_pad = _round_up(E, tile_e_eff)
    if E_pad != E:
        attr = jnp.pad(attr, ((0, E_pad - E), (0, 0)))   # padded rows sliced off

    grid = (E_pad // tile_e_eff,)
    kernel = functools.partial(_bond_encoder_kernel, num_features=F)

    out = pl.pallas_call(
        kernel,
        out_shape=jax.ShapeDtypeStruct((E_pad, Dp), jnp.float32),
        grid_spec=pltpu.PrefetchScalarGridSpec(
            num_scalar_prefetch=0,
            grid=grid,
            in_specs=[
                pl.BlockSpec((tile_e_eff, F), lambda i: (i, 0)),
                pl.BlockSpec((K, Dp), lambda i: (0, 0)),
            ],
            out_specs=pl.BlockSpec((tile_e_eff, Dp), lambda i: (i, 0)),
        ),
        compiler_params=pltpu.CompilerParams(
            dimension_semantics=("parallel",)),
    )(attr, fused)

    return out[:E, :D]


def xavier_uniform(key, shape, dtype=jnp.float32):
    fan_in, fan_out = shape[0], shape[1]
    bound = (6.0 / (fan_in + fan_out)) ** 0.5
    return jax.random.uniform(key, shape, dtype=dtype, minval=-bound, maxval=bound)


def init_bond_encoder_params(key, emb_dim):
    tables = []
    for dim in FULL_BOND_FEATURE_DIMS:
        key, sub = jax.random.split(key)
        tables.append(xavier_uniform(sub, (dim, emb_dim)))
    return tables


def bond_encoder_reference(edge_attr, tables):
    out = 0
    for i, t in enumerate(tables):
        out = out + jnp.take(t, edge_attr[..., i], axis=0)
    return out


if __name__ == "__main__":
    emb_dim = 32
    num_edges = 16

    key = jax.random.PRNGKey(0)
    key, pkey = jax.random.split(key)
    tables = init_bond_encoder_params(pkey, emb_dim)

    # Deterministic example edge attributes: each column in [0, dim_i).
    cols = []
    for dim in FULL_BOND_FEATURE_DIMS:
        key, sub = jax.random.split(key)
        cols.append(jax.random.randint(sub, (num_edges, 1), 0, dim, dtype=jnp.int32))
    edge_attr = jnp.concatenate(cols, axis=-1)   # [E, F] int32

    out = bond_encoder_pallas(edge_attr, tables)
    out = jax.block_until_ready(out)

    ref = bond_encoder_reference(edge_attr, tables)
    assert out.shape == (num_edges, emb_dim)
    assert jnp.allclose(out, ref, atol=1e-5, rtol=1e-5), "mismatch vs reference"

    print("KERNEL_OK")
</pallas_src>

<mosaic_0001>
module attributes {stable_mosaic.version = 11 : i64} {
  func.func @_bond_encoder_kernel(%arg0: i32, %arg1: memref<16x3xi32, #tpu.memory_space<vmem>>, %arg2: memref<16x128xf32, #tpu.memory_space<vmem>>, %arg3: memref<16x128xf32, #tpu.memory_space<vmem>>) attributes {dimension_semantics = [#tpu.dimension_semantics<parallel>], iteration_bounds = array<i64: 1>, scalar_prefetch = 0 : i64, scratch_operands = 0 : i64, tpu.core_type = #tpu.core_type<tc>, window_params = [{transform_indices = @transform_0, window_bounds = array<i64: 16, 3>}, {pipeline_mode = #tpu.pipeline_mode<synchronous>, transform_indices = @transform_1, window_bounds = array<i64: 16, 128>}, {transform_indices = @transform_2, window_bounds = array<i64: 16, 128>}]} {
    %c0 = arith.constant 0 : index
    %c0_0 = arith.constant 0 : index
    %0 = vector.load %arg1[%c0, %c0_0] : memref<16x3xi32, #tpu.memory_space<vmem>>, vector<16x3xi32>
    %1 = tpu.iota {dimensions = array<i32: 1>} : vector<16x16xi32>
    %cst = arith.constant 0.000000e+00 : f32
    %2 = vector.broadcast %cst : f32 to vector<16x16xf32>
    %3 = vector.extract_strided_slice %0 {offsets = [0, 0], sizes = [16, 1], strides = [1, 1]} : vector<16x3xi32> to vector<16x1xi32>
    %4 = vector.broadcast %3 : vector<16x1xi32> to vector<16x16xi32>
    %5 = arith.cmpi eq, %1, %4 : vector<16x16xi32>
    %6 = arith.extui %5 : vector<16x16xi1> to vector<16x16xi32>
    %7 = arith.sitofp %6 : vector<16x16xi32> to vector<16x16xf32>
    %8 = arith.addf %2, %7 : vector<16x16xf32>
    %9 = vector.extract_strided_slice %0 {offsets = [0, 1], sizes = [16, 1], strides = [1, 1]} : vector<16x3xi32> to vector<16x1xi32>
    %10 = vector.broadcast %9 : vector<16x1xi32> to vector<16x16xi32>
    %11 = arith.cmpi eq, %1, %10 : vector<16x16xi32>
    %12 = arith.extui %11 : vector<16x16xi1> to vector<16x16xi32>
    %13 = arith.sitofp %12 : vector<16x16xi32> to vector<16x16xf32>
    %14 = arith.addf %8, %13 : vector<16x16xf32>
    %15 = vector.extract_strided_slice %0 {offsets = [0, 2], sizes = [16, 1], strides = [1, 1]} : vector<16x3xi32> to vector<16x1xi32>
    %16 = vector.broadcast %15 : vector<16x1xi32> to vector<16x16xi32>
    %17 = arith.cmpi eq, %1, %16 : vector<16x16xi32>
    %18 = arith.extui %17 : vector<16x16xi1> to vector<16x16xi32>
    %19 = arith.sitofp %18 : vector<16x16xi32> to vector<16x16xf32>
    %20 = arith.addf %14, %19 : vector<16x16xf32>
    %c0_1 = arith.constant 0 : index
    %c0_2 = arith.constant 0 : index
    %21 = vector.load %arg2[%c0_1, %c0_2] : memref<16x128xf32, #tpu.memory_space<vmem>>, vector<16x128xf32>
    %cst_3 = arith.constant dense<0.000000e+00> : vector<16x128xf32>
    %22 = tpu.matmul %20, %21, %cst_3 {dimension_numbers = #tpu.dot_dimension_numbers<[1], [0], [0], [1], [0, 0, 1, 1], [], []>} : vector<16x16xf32>, vector<16x128xf32>, vector<16x128xf32> -> vector<16x128xf32>
    %c0_4 = arith.constant 0 : index
    %c0_5 = arith.constant 0 : index
    %23 = vector.load %arg3[%c0_4, %c0_5] : memref<16x128xf32, #tpu.memory_space<vmem>>, vector<16x128xf32>
    tpu.vector_store %arg3[%c0_4, %c0_5], %22 {strides = array<i32>} : memref<16x128xf32, #tpu.memory_space<vmem>>, vector<16x128xf32>,
    return
  }
  func.func @transform_0(%arg0: i32) -> (i32, i32) {
    %c0_i32 = arith.constant 0 : i32
    %c0_i32_0 = arith.constant 0 : i32
    return %arg0, %c0_i32 : i32, i32
  }
  func.func @transform_1(%arg0: i32) -> (i32, i32) {
    %c0_i32 = arith.constant 0 : i32
    %c0_i32_0 = arith.constant 0 : i32
    %c0_i32_1 = arith.constant 0 : i32
    return %c0_i32, %c0_i32_0 : i32, i32
  }
  func.func @transform_2(%arg0: i32) -> (i32, i32) {
    %c0_i32 = arith.constant 0 : i32
    %c0_i32_0 = arith.constant 0 : i32
    return %arg0, %c0_i32 : i32, i32
  }
}

</mosaic_0001>

<bundles_post_ra>
// kernel: tpu_custom_call.1
= control target key start
LH: loop header
LB: loop body
LE: loop exit
PB: predicated region body
PF: predicated region fallthrough
CT: control target
= control target key end

     0   :  { %v220_v2 = vmov 0   ;;  %s266_s0 = inlined_call_operand.vmem [shape: s32[16,3], index: 0, kind: input, shape index: {}]   ;;  %s267_s1 = inlined_call_operand.vmem [shape: f32[16,128], index: 1, kind: input, shape index: {}]   ;;  %s268_s2 = inlined_call_operand.hbm [shape: f32[16,128], index: 2, kind: output, shape index: {}]  }
   0x1   :  { %v13_v0 = vld [vmem:[%s266_s0 + $0x8] sm:$0xff]  ;;  %v12_v1 = vld [vmem:[%s266_s0] sm:$0xff]  ;;  %192 = vset.pattern.permute.xlu1 %v220_v2  ;;  %190 = vset.pattern.permute.xlu0 %v220_v2 }
   0x2   :  { %7 = vsyncpa [#allocation3], 0  ;;  %20 = vperm.xlu1 %192, %v13_v0   ;;  %17 = vperm.xlu0 %190, %v12_v1   ;;  %v221_v3 = vmov 1   ;;  %v58_v4 = vld [vmem:[%s267_s1] sm:$0xff]  ;;  %v59_v5 = vld [vmem:[%s267_s1 + $0x8] sm:$0xff]  ;;  %v222_v6 = vmov 2   ;;  %v14_v8 = vlaneseq }
   0x3   :  { %v179_v7 = vpack.c.bf16 %v59_v5, %v58_v4  ;;  %v223_v14 = vmov 0.0   ;;  %vm60_vm6 = vcmask 130048   ;;  %s224_s0 = smov [#allocation2]  }
   0x4   :  { %v15_v11 = vand.u32 127, %v14_v8  ;;  %s149_s1 = sshll.u32 %s224_s0, 4  ;;  %s150_s1 = int_to_ptr.vmem [resolvable:$true] %s149_s1 }
   0x5   :  { %180 = vmatprep.subr.bf16.mxu0 %v179_v7  ;;  %s196_s17 = scalar_lea.vmem %s150_s1, 256  ;;  %p201_p1 = scmp.lt.s32.totalorder %s150_s1, %s150_s1 }
   0x6   :  { %193 = vset.pattern.permute.xlu1 %v221_v3  ;;  %191 = vset.pattern.permute.xlu0 %v221_v3  ;;  %p197_p0 = scmp.ne.s32.totalorder %s150_s1, %s196_s17  ;;  %p202_p2 = scmp.lt.s32.totalorder %s196_s17, %s196_s17 }
   0x7   :  { %34 = vperm.xlu1 %193, %v13_v0   ;;  %31 = vperm.xlu0 %191, %v12_v1  }
   0x8   :  { %182 = vmatpush3.bf16.msra.mxu0 %v179_v7  ;;  %p203_p3 = por %p202_p2, %p201_p1 }
   0xa   :  { %p204_p4 = pnand %p203_p3, %p197_p0 }
   0xb   :  { %194 = vset.pattern.permute.xlu1 %v222_v6  ;;  %195 = vset.pattern.permute.xlu0 %v222_v6 }
   0xc   :  { %45 = vperm.xlu1 %194, %v12_v1   ;;  %48 = vperm.xlu0 %195, %v13_v0  }
  0x81   :  { %v21_v9 = vpop.permute.xlu1 %20  ;;  %v18_v10 = vpop.permute.xlu0 %17 }
  0x82   :  { %vm23_vm2 = vcmp.eq.s32.totalorder %v15_v11, %v21_v9  ;;  %vm22_vm3 = vcmp.eq.s32.totalorder %v15_v11, %v18_v10 }
  0x83   :  { %v161_v17 = vsel %vm23_vm2, 1.0, %v223_v14  ;;  %v160_v18 = vsel %vm22_vm3, 1.0, %v223_v14 }
  0x86   :  { %v35_v12 = vpop.permute.xlu1 %34  ;;  %v32_v13 = vpop.permute.xlu0 %31 }
  0x87   :  { %vm37_vm0 = vcmp.eq.s32.totalorder %v15_v11, %v35_v12  ;;  %vm36_vm1 = vcmp.eq.s32.totalorder %v15_v11, %v32_v13 }
  0x88   :  { %v163_v15 = vsel %vm37_vm0, 1.0, %v223_v14  ;;  %v162_v16 = vsel %vm36_vm1, 1.0, %v223_v14 }
  0x89   :  { %v43_v21 = vadd.f32 %v163_v15, %v161_v17  ;;  %v42_v22 = vadd.f32 %v162_v16, %v160_v18 }
  0x8b   :  { %v46_v19 = vpop.permute.xlu1 %45  ;;  %v49_v20 = vpop.permute.xlu0 %48 }
  0x8c   :  { %vm50_vm4 = vcmp.eq.s32.totalorder %v15_v11, %v46_v19  ;;  %vm51_vm5 = vcmp.eq.s32.totalorder %v15_v11, %v49_v20 }
  0x8d   :  { %v164_v23 = vsel %vm50_vm4, 1.0, %v223_v14  ;;  %v165_v24 = vsel %vm51_vm5, 1.0, %v223_v14 }
  0x8e   :  { %v57_v25 = vadd.f32 %v165_v24, %v43_v21  ;;  %v56_v26 = vadd.f32 %v164_v23, %v42_v22 }
  0x90   :  { %176 = vmatprep.mubr.msk.f32.mxu0 %vm60_vm6, %v56_v26 }
  0x91   :  { %177 = vmatmul.mubr.msk.f32.vlgmr.msra.gmra.mrb[0].mxu0 %vm60_vm6, %v57_v25 }
 0x164   :  { %v178_v27 = vpop.f32.mrb[0].mxu0 }
 0x165   :  { %143 = vst [vmem:[#allocation2 + $0x8] sm:$0xff] %v178_v27  ;;  %v133_v28 = vpop.f32.mrb[1].mxu0 }
 0x166   :  { %142 = vst [vmem:[#allocation2] sm:$0xff] %v133_v28 }
 0x167   :  { %207 = shalt.err (!%p204_p4)
}
 0x168   :  { %s208_s20 = scalar_lea.hbm %s268_s2, 256 }
 0x169   :  { %p209_p5 = scmp.ne.s32.totalorder %s268_s2, %s208_s20  ;;  %p212_p6 = scmp.lt.u32.totalorder %s208_s20, %s268_s2 }
 0x16b   :  { %p214_p7 = pnand %p212_p6, %p209_p5 }
 0x16d   :  { %217 = shalt.err (!%p214_p7)
}
 0x16e   :  { %s225_s25 = smov 128   ;;  %s226_s26 = smov 8  }
 0x16f   :  { %155 = dma.vmem_to_hbm [thread:$0]  %s150_s1, 256, %s268_s2, [#allocation3], %s225_s25, %s225_s25, %s226_s26  }
 0x170   :  { %218 = dma.done.wait [#allocation3], 256  }
 0x171   :  { %219 = vsyncadd [#allocation3], 4294967040 }
 0x172   :  { %159 = vsyncpa [#allocation3], 1 }

</bundles_post_ra>
